<compile_context>
chip_gen: v6e
topology: v6e:2x2x1
jax: 0.10.0
libtpu: 0.0.40
codegen_flags: <defaults>
</compile_context>

<pallas_src>
import functools

import jax
import jax.numpy as jnp
from jax.experimental import pallas as pl
from jax.experimental.pallas import tpu as pltpu


def _layernorm_kernel(x_ref, a_ref, b_ref, o_ref, *, eps, feat):
    x = x_ref[...].astype(jnp.float32)               # (rows_tile, F)
    a = a_ref[...].astype(jnp.float32)               # (1, F)
    b = b_ref[...].astype(jnp.float32)               # (1, F)

    inv_f = jnp.float32(1.0 / feat)
    mean = jnp.sum(x, axis=-1, keepdims=True) * inv_f        # (rows_tile, 1)
    centered = x - mean

    # Two-pass unbiased variance (torch.std default, ddof=1). Numerically
    # stable; the second XLU reduction is free (kernel is HBM-bound).
    # max(feat-1, 1) guards the degenerate feat==1 case (torch yields NaN
    # there; we return 0-variance output instead of dividing by zero).
    var = jnp.sum(centered * centered, axis=-1, keepdims=True) * jnp.float32(
        1.0 / max(feat - 1, 1))
    std = jnp.sqrt(var)

    # Per-row reciprocal on a thin (rows_tile, 1) column instead of a
    # full-width (rows_tile, F) divide. approx=False keeps 1e-5 tolerance.
    r = pl.reciprocal(std + jnp.float32(eps), approx=False)

    o_ref[...] = (a * (centered * r) + b).astype(o_ref.dtype)


def _vmem_capacity_bytes():
    """Physical VMEM per TensorCore; conservative (v7x, 64 MiB) on failure."""
    try:
        return int(pltpu.get_tpu_info().vmem_capacity_bytes)
    except Exception:
        return 64 << 20


def _default_rows_per_tile(rows, feat, in_itemsize, out_itemsize, buffers):
    """Pick the row-tile height from real byte budgets (dtype-aware)."""
    # Per-generation VMEM budget: stay within ~70% of physical VMEM and never
    # above 48 MiB scoped (bounded for the 64 MiB-per-TC v7x part; v5e/v6e
    # with 128 MiB have plenty of headroom at 48 MiB).
    budget = min(int(_vmem_capacity_bytes() * 0.70), 48 << 20)

    # Bytes live per tile row across the pipeline:
    #   `buffers` x input + `buffers` x output (actual dtypes)
    #   + ~2 rows' worth of f32 temporaries inside the kernel body.
    bytes_per_row = feat * (buffers * (in_itemsize + out_itemsize) + 2 * 4)
    rpt_budget = max(8, budget // max(bytes_per_row, 1))

    # Target ~4 MiB of *real HBM bytes* per input DMA so the ~0.35 us fixed
    # per-step cost is negligible. Cap by bytes, not by a hard row count.
    target_dma_bytes = 4 * 1024 * 1024
    rpt_dma = max(8, target_dma_bytes // max(feat * in_itemsize, 1))

    rpt = min(rpt_budget, rpt_dma)

    # Guarantee enough grid steps for megacore (2 TCs on v7x) + pipelining:
    # aim for >= 8 steps when the row count allows it.
    min_steps = 8
    rpt = min(rpt, max(8, -(-rows // min_steps)))   # cdiv(rows, min_steps)

    rpt = min(rpt, rows)
    rpt = max(8, (rpt // 8) * 8)                    # sublane multiple
    return int(rpt)


def layer_norm(x, a_2, b_2, eps=1e-6, rows_per_tile=None, buffers=2):
    """x: (..., features). a_2, b_2: (features,). Returns same shape/dtype as x.

    `buffers` is the pipeline depth per streamed array (2 = double buffering;
    sweep 3 via pl.Buffered if profiling shows exposed DMA).
    """
    orig_shape = x.shape
    feat = int(orig_shape[-1])
    rows = 1
    for d in orig_shape[:-1]:
        rows *= int(d)

    x2 = x.reshape(rows, feat)
    a2 = a_2.reshape(1, feat)
    b2 = b_2.reshape(1, feat)

    in_itemsize = int(x.dtype.itemsize)
    out_itemsize = int(x.dtype.itemsize)

    if rows_per_tile is None:
        rows_per_tile = _default_rows_per_tile(
            rows, feat, in_itemsize, out_itemsize, buffers)

    # cdiv so trailing rows are never silently dropped; Pallas masks the
    # ragged last block on load/store (reduction axis is untiled, so the
    # padded rows never contaminate valid outputs).
    grid = (pl.cdiv(rows, rows_per_tile),)

    # Explicit scoped-VMEM request: buffered in/out tiles + params + f32
    # temporaries + headroom, bounded at 48 MiB for the 64 MiB v7x part.
    tile_in_bytes = rows_per_tile * feat * in_itemsize
    tile_out_bytes = rows_per_tile * feat * out_itemsize
    tile_f32_bytes = rows_per_tile * feat * 4
    param_bytes = 2 * feat * int(a_2.dtype.itemsize) * 2
    vmem_need = (buffers * (tile_in_bytes + tile_out_bytes)
                 + 2 * tile_f32_bytes + param_bytes)
    vmem_limit = int(min(max(vmem_need + (8 << 20), 32 << 20), 48 << 20))

    pipeline_mode = pl.Buffered(buffers) if buffers != 2 else None

    x_spec = pl.BlockSpec((rows_per_tile, feat), lambda i: (i, 0))
    o_spec = pl.BlockSpec((rows_per_tile, feat), lambda i: (i, 0))
    if pipeline_mode is not None:
        x_spec = pl.BlockSpec((rows_per_tile, feat), lambda i: (i, 0),
                              pipeline_mode=pipeline_mode)
        o_spec = pl.BlockSpec((rows_per_tile, feat), lambda i: (i, 0),
                              pipeline_mode=pipeline_mode)

    out = pl.pallas_call(
        functools.partial(_layernorm_kernel, eps=eps, feat=feat),
        out_shape=jax.ShapeDtypeStruct((rows, feat), x.dtype),
        grid_spec=pltpu.PrefetchScalarGridSpec(
            num_scalar_prefetch=0,
            grid=grid,
            in_specs=[
                x_spec,
                pl.BlockSpec((1, feat), lambda i: (0, 0)),
                pl.BlockSpec((1, feat), lambda i: (0, 0)),
            ],
            out_specs=o_spec,
        ),
        compiler_params=pltpu.CompilerParams(
            # Row tiles are independent -> shard across TensorCores (v7x).
            dimension_semantics=("parallel",),
            vmem_limit_bytes=vmem_limit,
        ),
    )(x2, a2, b2)
    return out.reshape(orig_shape)


def layer_norm_ref(x, a_2, b_2, eps=1e-6):
    """Pure-JAX reference matching the PyTorch module (unbiased std, eps outside sqrt)."""
    xf = x.astype(jnp.float32)
    mean = jnp.mean(xf, axis=-1, keepdims=True)
    var = jnp.sum((xf - mean) ** 2, axis=-1, keepdims=True) / max(x.shape[-1] - 1, 1)
    std = jnp.sqrt(var)
    return (a_2 * (xf - mean) / (std + eps) + b_2).astype(x.dtype)


if __name__ == "__main__":
    key = jax.random.PRNGKey(0)
    batch, seq, hidden = 2, 8, 32

    x = jax.random.normal(key, (batch, seq, hidden), dtype=jnp.float32)
    # Deterministic parameter init mirroring nn.Parameter(torch.ones/zeros(features))
    a_2 = jnp.ones((hidden,), dtype=jnp.float32)
    b_2 = jnp.zeros((hidden,), dtype=jnp.float32)

    out = layer_norm(x, a_2, b_2, eps=1e-6)
    out = jax.block_until_ready(out)

    ref = layer_norm_ref(x, a_2, b_2, eps=1e-6)
    assert out.shape == x.shape and out.dtype == x.dtype
    assert jnp.allclose(out, ref, atol=1e-5, rtol=1e-5), "mismatch vs reference"

    # Also exercise an offset-heavy input (stresses the variance numerics)
    # and a ragged row count (masked last block).
    x2 = 100.0 + 0.5 * jax.random.normal(jax.random.PRNGKey(1), (3, 5, hidden),
                                         dtype=jnp.float32)
    out2 = jax.block_until_ready(layer_norm(x2, a_2, b_2, eps=1e-6))
    ref2 = layer_norm_ref(x2, a_2, b_2, eps=1e-6)
    assert jnp.allclose(out2, ref2, atol=1e-5, rtol=1e-5), "mismatch (offset input)"

    print("KERNEL_OK")
</pallas_src>

<mosaic_0001>
module attributes {stable_mosaic.version = 11 : i64} {
  func.func @_layernorm_kernel(%arg0: i32, %arg1: memref<8x32xf32, #tpu.memory_space<vmem>>, %arg2: memref<1x32xf32, #tpu.memory_space<vmem>>, %arg3: memref<1x32xf32, #tpu.memory_space<vmem>>, %arg4: memref<8x32xf32, #tpu.memory_space<vmem>>) attributes {dimension_semantics = [#tpu.dimension_semantics<parallel>], iteration_bounds = array<i64: 2>, scalar_prefetch = 0 : i64, scratch_operands = 0 : i64, tpu.core_type = #tpu.core_type<tc>, window_params = [{transform_indices = @transform_0, window_bounds = array<i64: 8, 32>}, {pipeline_mode = #tpu.pipeline_mode<synchronous>, transform_indices = @transform_1, window_bounds = array<i64: 1, 32>}, {pipeline_mode = #tpu.pipeline_mode<synchronous>, transform_indices = @transform_2, window_bounds = array<i64: 1, 32>}, {transform_indices = @transform_3, window_bounds = array<i64: 8, 32>}]} {
    %c0 = arith.constant 0 : index
    %c0_0 = arith.constant 0 : index
    %0 = vector.load %arg1[%c0, %c0_0] : memref<8x32xf32, #tpu.memory_space<vmem>>, vector<8x32xf32>
    %c0_1 = arith.constant 0 : index
    %c0_2 = arith.constant 0 : index
    %1 = vector.load %arg2[%c0_1, %c0_2] : memref<1x32xf32, #tpu.memory_space<vmem>>, vector<1x32xf32>
    %c0_3 = arith.constant 0 : index
    %c0_4 = arith.constant 0 : index
    %2 = vector.load %arg3[%c0_3, %c0_4] : memref<1x32xf32, #tpu.memory_space<vmem>>, vector<1x32xf32>
    %cst = arith.constant dense<0.000000e+00> : vector<8xf32>
    %3 = vector.multi_reduction <add>, %0, %cst [1] : vector<8x32xf32> to vector<8xf32>
    %4 = vector.shape_cast %3 : vector<8xf32> to vector<8x1xf32>
    %cst_5 = arith.constant 3.125000e-02 : f32
    %5 = vector.broadcast %cst_5 : f32 to vector<8x1xf32>
    %6 = arith.mulf %4, %5 : vector<8x1xf32>
    %7 = vector.broadcast %6 : vector<8x1xf32> to vector<8x32xf32>
    %8 = arith.subf %0, %7 : vector<8x32xf32>
    %9 = arith.mulf %8, %8 : vector<8x32xf32>
    %cst_6 = arith.constant dense<0.000000e+00> : vector<8xf32>
    %10 = vector.multi_reduction <add>, %9, %cst_6 [1] : vector<8x32xf32> to vector<8xf32>
    %11 = vector.shape_cast %10 : vector<8xf32> to vector<8x1xf32>
    %cst_7 = arith.constant 0.0322580636 : f32
    %12 = vector.broadcast %cst_7 : f32 to vector<8x1xf32>
    %13 = arith.mulf %11, %12 : vector<8x1xf32>
    %14 = math.sqrt %13 : vector<8x1xf32>
    %cst_8 = arith.constant 9.99999997E-7 : f32
    %15 = vector.broadcast %cst_8 : f32 to vector<8x1xf32>
    %16 = arith.addf %14, %15 : vector<8x1xf32>
    %17 = tpu.reciprocal %16 : vector<8x1xf32> -> vector<8x1xf32>
    %18 = vector.broadcast %17 : vector<8x1xf32> to vector<8x32xf32>
    %19 = arith.mulf %8, %18 : vector<8x32xf32>
    %20 = vector.broadcast %1 : vector<1x32xf32> to vector<8x32xf32>
    %21 = arith.mulf %20, %19 : vector<8x32xf32>
    %22 = vector.broadcast %2 : vector<1x32xf32> to vector<8x32xf32>
    %23 = arith.addf %21, %22 : vector<8x32xf32>
    %c0_9 = arith.constant 0 : index
    %c0_10 = arith.constant 0 : index
    %24 = vector.load %arg4[%c0_9, %c0_10] : memref<8x32xf32, #tpu.memory_space<vmem>>, vector<8x32xf32>
    tpu.vector_store %arg4[%c0_9, %c0_10], %23 {strides = array<i32>} : memref<8x32xf32, #tpu.memory_space<vmem>>, vector<8x32xf32>,
    return
  }
  func.func @transform_0(%arg0: i32) -> (i32, i32) {
    %c0_i32 = arith.constant 0 : i32
    %c0_i32_0 = arith.constant 0 : i32
    return %arg0, %c0_i32 : i32, i32
  }
  func.func @transform_1(%arg0: i32) -> (i32, i32) {
    %c0_i32 = arith.constant 0 : i32
    %c0_i32_0 = arith.constant 0 : i32
    %c0_i32_1 = arith.constant 0 : i32
    return %c0_i32, %c0_i32_0 : i32, i32
  }
  func.func @transform_2(%arg0: i32) -> (i32, i32) {
    %c0_i32 = arith.constant 0 : i32
    %c0_i32_0 = arith.constant 0 : i32
    %c0_i32_1 = arith.constant 0 : i32
    return %c0_i32, %c0_i32_0 : i32, i32
  }
  func.func @transform_3(%arg0: i32) -> (i32, i32) {
    %c0_i32 = arith.constant 0 : i32
    %c0_i32_0 = arith.constant 0 : i32
    return %arg0, %c0_i32 : i32, i32
  }
}

</mosaic_0001>

<bundles_post_ra>
// kernel: tpu_custom_call.1
= control target key start
LH: loop header
LB: loop body
LE: loop exit
PB: predicated region body
PF: predicated region fallthrough
CT: control target
= control target key end

     0   :  { %8 = vsyncpa [#allocation3], 0  ;;  %s643_s0 = inlined_call_operand.hbm [shape: f32[16,32], index: 0, kind: input, shape index: {}]   ;;  %s644_s1 = inlined_call_operand.vmem [shape: f32[1,32], index: 1, kind: input, shape index: {}]   ;;  %s645_s2 = inlined_call_operand.vmem [shape: f32[1,32], index: 2, kind: input, shape index: {}]   ;;  %s646_s3 = inlined_call_operand.hbm [shape: f32[16,32], index: 3, kind: output, shape index: {}]  }
   0x1   :  { %10 = vsyncpa [#allocation3 + $0x1], 0 }
   0x2   :  { %11 = vsyncpa [#allocation4], 0 }
   0x3   :  { %13 = vsyncpa [#allocation4 + $0x1], 0  ;;  %s489_s12 = smov 0   ;;  %s491_s13 = smov 0  }
   0x4   :  { %s493_s14 = smov 0   ;;  %s495_s15 = smov 0  }
   0x5 LB: > { %s510_s16 = sadd.s32 4294967295, %s465_s15   ;;  %s309_s17 = sadd.s32 4294967294, %s465_s15   ;;  %s465_s15 = sphi %s495_s15, %s663_s15   ;;  %s461_s14 = sphi %s493_s14, %s662_s14   ;;  %s457_s13 = sphi %s491_s13, %s661_s13   ;;  %s453_s12 = sphi %s489_s12, %s660_s12  }
   0x6   : > { %s514_s18 = sadd.s32 1, %s465_s15   ;;  %s26_s19 = sadd.s32 1, %s461_s14 }
   0x7   : > { %s23_s20 = ssub.s32 %s465_s15, %s514_s18  ;;  %p33_p0 = scmp.ne.s32.totalorder %s461_s14, %s457_s13 }
   0x8   : > { %p24_p1 = scmp.eq.s32.totalorder %s23_s20, 0  ;;  %p34_p2 = scmp.eq.s32.totalorder %s465_s15, 0 }
   0x9   : > { %p39_p3 = scmp.ne.s32.totalorder %s457_s13, %s453_s12  ;;  %p40_p4 = scmp.eq.s32.totalorder %s510_s16, 0 }
   0xa   : > { %s526_s21 = scalar_select %p24_p1, %s461_s14, %s26_s19  }
   0xb   : > { %p528_p5 = por %p34_p2, %p33_p0  ;;  %p532_p6 = por %p40_p4, %p39_p3 }
   0xc   : > { %p105_p7 = scmp.eq.s32.totalorder %s510_s16, 1  ;;  %p111_p8 = scmp.eq.s32.totalorder %s309_s17, 1 }
   0xd   : > { %s650_s23 = scalar_select %p532_p6, 1, 0 }
   0xe   : > { %p335_p10 = scmp.lt.s32.totalorder %s465_s15, 2  ;;  %p539_p11 = por %p105_p7, %p33_p0 }
   0xf   : > { %p543_p12 = por %p111_p8, %p39_p3  ;;  %s137_s26 = sand.u32 1, %s461_s14  }
  0x10   : > { %s651_s24 = scalar_select %p539_p11, 1, 0 }
  0x11   : > { %s652_s25 = scalar_select %p543_p12, 1, 0 }
  0x12   : > { %s313_s27 = sshll.u32 %s465_s15, 7  ;;  %s312_s28 = sshll.u32 %s137_s26, 3 }
  0x13   : > { %s552_s4 = scalar_lea.hbm %s643_s0, %s313_s27  ;;  %s141_s5 = scalar_lea.vmem [#allocation2], %s312_s28 }
  0x14   : > { %s148_s6 = sshll.u32 %s141_s5, 4  ;;  %p556_p13 = pnand %p335_p10, %p528_p5  ;;  %s560_s6 = int_to_ptr.vmem [resolvable:$true] %s148_s6 }
  0x15   : > { %s138_s8 = scalar_lea.sflag [#allocation3], %s137_s26  ;;  %s373_s9 = scalar_lea.hbm %s552_s4, 128 }
  0x16   : > { %p374_p2 = scmp.ne.s32.totalorder %s552_s4, %s373_s9  ;;  %p375_p3 = pneg %p556_p13 }
  0x17   : > { %s378_s17 = scalar_lea.hbm %s643_s0, 256  ;;  %p379_p5 = scmp.lt.s32.totalorder %s552_s4, %s643_s0 }
  0x18   : > { %p376_p4 = pnand %p375_p3, %p374_p2  ;;  %p380_p8 = scmp.lt.s32.totalorder %s378_s17, %s373_s9 }
  0x1a   : > { %p377_p7 = pneg %p376_p4  ;;  %p381_p10 = por %p380_p8, %p379_p5 }
  0x1c   : > { %p382_p9 = pnand %p381_p10, %p377_p7 }
  0x1e   : > { %385 = shalt.err (!%p382_p9)
}
  0x1f   : > { %s386_s22 = scalar_lea.vmem %s560_s6, 128  ;;  %s467_s26 = smov [#allocation2]  }
  0x20   : > { %p387_p0 = scmp.ne.s32.totalorder %s560_s6, %s386_s22  ;;  %s391_s27 = sshll.u32 %s467_s26, 4  ;;  %s392_s27 = int_to_ptr.vmem [resolvable:$false] %s391_s27 }
  0x21   : > { %s393_s28 = scalar_lea.vmem %s392_s27, 256  ;;  %p394_p4 = scmp.lt.s32.totalorder %s560_s6, %s392_s27 }
  0x22   : > { %p389_p1 = pnand %p387_p0, %p375_p3  ;;  %p395_p12 = scmp.lt.s32.totalorder %s393_s28, %s386_s22 }
  0x24   : > { %p390_p2 = pneg %p389_p1  ;;  %p396_p11 = por %p395_p12, %p394_p4 }
  0x26   : > { %p397_p6 = pnand %p396_p11, %p390_p2 }
  0x28   : > { %400 = shalt.err (!%p397_p6)
}
  0x29   : > { %330 = dma.hbm_to_vmem [thread:$0]  (!%p556_p13), %s552_s4, 128, %s560_s6, %s138_s8  }
  0x2a   : > { %p654_p9 = scmp.lt.s32.totalorder %s465_s15, 3  ;;  %p655_p7 = scmp.ge.s32.totalorder %s465_s15, 1 }
  0x2c   : > { %p154_p0 = pnand %p655_p7, %p654_p9 }
  0x2d   : > { %s587_s29 = sand.u32 (!%p154_p0), 1, %s457_s13   ;;  %p656_p6 = scmp.ne.s32.totalorder (!%p154_p0), %s650_s23, 0 }
  0x2e   : > { %157 = sbr.rel (%p154_p0) target bundleno = 392 (0x188), region = 32  ;;  %s315_s30 = sshll.u32 (!%p154_p0), %s587_s29, 3 }
  0x2f   : > { %s160_s5 = scalar_lea.sflag (!%p154_p0), [#allocation3], %s587_s29  ;;  %s163_s7 = scalar_lea.vmem (!%p154_p0), [#allocation2], %s315_s30 }
  0x33   : > { %444 = dma.done.wait (%p656_p6), %s160_s5, 128  }
  0x34   : > { %446 = vsyncadd (%p656_p6), %s160_s5, 4294967168  ;;  %vm189_vm0 = vcmask 261120   ;;  %v186_v0 = vld [vmem:[%s163_s7] sm:$0xff]  ;;  %s320_s9 = sshll.u32 %s510_s16, 7  ;;  %s185_s10 = scalar_lea.vmem [#allocation5], %s315_s30 }
  0x35   : > { %v190_v1 = vsel %vm189_vm0, %v186_v0, 0.0  ;;  %v317_v16 = vld [vmem:[%s644_s1] ss:$0 sm:$0xff]  ;;  %s239_s11 = sshll.u32 %s185_s10, 4  ;;  %s237_s20 = scalar_lea.hbm %s646_s3, %s320_s9  ;;  %s240_s11 = int_to_ptr.vmem [resolvable:$true] %s239_s11 }
  0x36   : > { %191 = vadd.xlane.f32.xlu0 %v190_v1  ;;  %v318_v18 = vld [vmem:[%s645_s2] ss:$0 sm:$0xff]  ;;  %s226_s22 = scalar_lea.sflag [#allocation4], %s587_s29  ;;  %s401_s26 = scalar_lea.vmem %s240_s11, 128 }
  0x37   : > { %p402_p11 = scmp.ne.s32.totalorder %s240_s11, %s401_s26  ;;  %p657_p12 = scmp.ne.s32.totalorder %s651_s24, 0 }
  0x38   : > { %s468_s27 = smov [#allocation5]  }
  0x39   : > { %p403_p13 = pnand %p402_p11, %p657_p12  ;;  %s405_s16 = sshll.u32 %s468_s27, 4  ;;  %s406_s16 = int_to_ptr.vmem [resolvable:$false] %s405_s16 }
  0x3a   : > { %s407_s28 = scalar_lea.vmem %s406_s16, 256  ;;  %p408_p3 = scmp.lt.s32.totalorder %s240_s11, %s406_s16 }
  0x3b   : > { %p404_p1 = pneg %p403_p13  ;;  %p409_p5 = scmp.lt.s32.totalorder %s407_s28, %s401_s26 }
  0x3d   : > { %p410_p8 = por %p409_p5, %p408_p3 }
  0x3f   : > { %p411_p10 = pnand %p410_p8, %p404_p1 }
  0xbf   : > { %v192_v2 = vpop.xlane.xlu0 %191 }
  0xc0   : > { %v193_v3 = vmul.f32 0.03125, %v192_v2 }
  0xc2   : > { %v194_v4 = vsub.f32 %v186_v0, %v193_v3 }
  0xc4   : > { %v195_v5 = vmul.f32 %v194_v4, %v194_v4 }
  0xc6   : > { %v196_v6 = vsel %vm189_vm0, %v195_v5, 0.0 }
  0xc7   : > { %197 = vadd.xlane.f32.xlu0 %v196_v6 }
 0x150   : > { %v198_v7 = vpop.xlane.xlu0 %197 }
 0x151   : > { %v199_v8 = vmul.f32 0.032258064, %v198_v7 }
 0x153   : > { %369 = vrsqrt.f32 %v199_v8  ;;  %vm202_vm1 = vcmp.eq.f32.partialorder %v199_v8, inf  ;;  %v205_v11 = vand.u32 2147483648, %v199_v8  ;;  %vm204_vm2 = vcmp.eq.f32.partialorder %v199_v8, 0.0 }
 0x160   : > { %v370_v9 = vpop.eup %369 }
 0x161   : > { %v201_v10 = vmul.f32 %v370_v9, %v199_v8 }
 0x163   : > { %v203_v12 = vsel %vm202_vm1, %v199_v8, %v201_v10 }
 0x164   : > { %v206_v13 = vsel %vm204_vm2, %v205_v11, %v203_v12 }
 0x165   : > { %v207_v14 = vadd.f32 1e-06, %v206_v13 }
 0x167   : > { %371 = vrcp.f32 %v207_v14 }
 0x174   : > { %v372_v15 = vpop.eup %371 }
 0x175   : > { %v209_v17 = vmul.f32 %v372_v15, %v194_v4 }
 0x177   : > { %v216_v19 = vmul.f32 %v317_v16, %v209_v17 }
 0x179   : > { %v223_v20 = vadd.f32 %v318_v18, %v216_v19 }
 0x17b   : > { %224 = vst.msk [vmem:[%s185_s10] sm:$0xff] %vm189_vm0, %v223_v20 }
 0x17c   : > { %414 = shalt.err (!%p411_p10)
}
 0x17d   : > { %s415_s30 = scalar_lea.hbm %s237_s20, 128  ;;  %s419_s7 = scalar_lea.hbm %s646_s3, 256 }
 0x17e   : > { %p416_p2 = scmp.ne.s32.totalorder %s237_s20, %s415_s30  ;;  %p420_p7 = scmp.lt.s32.totalorder %s237_s20, %s646_s3 }
 0x17f   : > { %p421_p0 = scmp.lt.s32.totalorder %s419_s7, %s415_s30 }
 0x180   : > { %p417_p4 = pnand %p416_p2, %p657_p12 }
 0x181   : > { %p422_p6 = por %p421_p0, %p420_p7 }
 0x182   : > { %p418_p9 = pneg %p417_p4 }
 0x184   : > { %p423_p11 = pnand %p422_p6, %p418_p9 }
 0x186   : > { %426 = shalt.err (!%p423_p11)
}
 0x187   : > { %325 = dma.vmem_to_hbm [thread:$0]  (%p657_p12), %s240_s11, 128, %s237_s20, %s226_s22  }
 0x188 PF: > { %s251_s6 = sand.u32 1, %s453_s12   ;;  %p658_p13 = scmp.ne.s32.totalorder %s652_s25, 0 }
 0x189   : > { %p659_p1 = scmp.ge.s32.totalorder %s465_s15, 2  ;;  %s252_s8 = scalar_lea.sflag [#allocation4], %s251_s6 }
 0x18b   : > { %p332_p3 = pnand %p659_p1, %p658_p13 }
 0x18d   : > { %p333_p5 = pneg %p332_p3 }
 0x18f   : > { %448 = dma.done.wait (%p333_p5), %s252_s8, 128  }
 0x190   : > { %450 = vsyncadd (%p333_p5), %s252_s8, 4294967168  ;;  %p16_p8 = scmp.ge.s32.totalorder %s514_s18, 4   ;;  %s660_s12 = smov %s457_s13 }
 0x191   : > { %s661_s13 = smov %s461_s14  ;;  %s662_s14 = smov %s526_s21 }
 0x192   : > { %s663_s15 = smov %s514_s18  ;;  %18 = sbr.rel (!%p16_p8) target bundleno = 5 (0x5), region = 77 }
 0x197   :  { %257 = vsyncpa [#allocation3], 1 }
 0x198   :  { %259 = vsyncpa [#allocation3 + $0x1], 1 }
 0x199   :  { %260 = vsyncpa [#allocation4], 1 }
 0x19a   :  { %262 = vsyncpa [#allocation4 + $0x1], 1 }

</bundles_post_ra>
